<compile_context>
chip_gen: v7x
topology: tpu7x:2x2x1
jax: 0.10.0
libtpu: 0.0.40
codegen_flags: <defaults>
</compile_context>

<pallas_src>
import jax
import jax.numpy as jnp
from jax.experimental import pallas as pl
from jax.experimental.pallas import tpu as pltpu

LEAKY_SLOPE = 0.01   # PyTorch nn.LeakyReLU default negative_slope
BN_EPS = 1e-5        # PyTorch nn.BatchNorm1d default eps
OUT_DIM = 2          # real output width of the final Linear(32, 2)
OUT_PAD = 128        # lane-dense padded output width


def _leaky_relu(x):
    return jnp.where(x > 0, x, LEAKY_SLOPE * x)


def _ceil_to(v, m):
    return ((v + m - 1) // m) * m


def deep_predictor_kernel(x_ref,
                          w1_ref, b1_ref,
                          w2_ref, b2_ref,
                          w3_ref, b3_ref,
                          w4_ref, b4_ref,
                          w5_ref, b5_ref,
                          out_ref):
    # Linear(input_dim,256)+BN folded -> LeakyReLU   (Dropout = identity in eval)
    h = jnp.dot(x_ref[...], w1_ref[...], preferred_element_type=jnp.float32) + b1_ref[...]
    h = _leaky_relu(h)
    # Linear(256,128)+BN folded -> LeakyReLU
    h = jnp.dot(h, w2_ref[...], preferred_element_type=jnp.float32) + b2_ref[...]
    h = _leaky_relu(h)
    # Linear(128,64)+BN folded -> LeakyReLU
    h = jnp.dot(h, w3_ref[...], preferred_element_type=jnp.float32) + b3_ref[...]
    h = _leaky_relu(h)
    # Linear(64,32) -> LeakyReLU
    h = jnp.dot(h, w4_ref[...], preferred_element_type=jnp.float32) + b4_ref[...]
    h = _leaky_relu(h)
    # Linear(32,2) padded to 128 lanes (unmasked, lane-dense store)
    out_ref[...] = (jnp.dot(h, w5_ref[...], preferred_element_type=jnp.float32)
                    + b5_ref[...])


def prepare_params(raw):
    """One-time offline transform: fold BN into weights, pad final layer to 128 lanes."""
    p = {}
    for li, has_bn in ((1, True), (2, True), (3, True), (4, False)):
        w = raw[f"w{li}"]
        b = raw[f"b{li}"]
        if has_bn:
            s = raw[f"s{li}"]          # (1, out)
            t = raw[f"t{li}"]          # (1, out)
            w = w * s                  # column scale
            b = b * s + t
        p[f"w{li}"] = w
        p[f"b{li}"] = b
    p["w5"] = jnp.pad(raw["w5"], ((0, 0), (0, OUT_PAD - OUT_DIM)))
    p["b5"] = jnp.pad(raw["b5"], ((0, 0), (0, OUT_PAD - OUT_DIM)))
    return p


def deep_predictor_forward(x, folded, *, row_tile=512):
    """x: [B, input_dim] f32. folded: output of prepare_params()."""
    B, F = x.shape

    # Row tile: multiple of 8 sublanes, capped at row_tile; pad batch to a multiple.
    tb = min(_ceil_to(row_tile, 8), _ceil_to(B, 8))
    b_pad = _ceil_to(B, tb)
    if b_pad != B:
        x = jnp.pad(x, ((0, b_pad - B), (0, 0)))
    grid = (b_pad // tb,)

    operands = (
        x,
        folded["w1"], folded["b1"],
        folded["w2"], folded["b2"],
        folded["w3"], folded["b3"],
        folded["w4"], folded["b4"],
        folded["w5"], folded["b5"],
    )

    # x blocked over the batch; weights/biases resident (constant index_map).
    in_specs = [pl.BlockSpec((tb, F), lambda i: (i, 0))]
    in_specs += [pl.BlockSpec(op.shape, lambda i: (0, 0)) for op in operands[1:]]
    out_spec = pl.BlockSpec((tb, OUT_PAD), lambda i: (i, 0))

    flops = 2 * b_pad * (F * 256 + 256 * 128 + 128 * 64 + 64 * 32 + 32 * OUT_PAD)
    weight_bytes = sum(int(v.size) * v.dtype.itemsize for v in operands[1:])
    cost = pl.CostEstimate(
        flops=flops,
        transcendentals=0,
        bytes_accessed=b_pad * (F + OUT_PAD) * 4 + weight_bytes,
    )

    out_padded = pl.pallas_call(
        deep_predictor_kernel,
        out_shape=jax.ShapeDtypeStruct((b_pad, OUT_PAD), jnp.float32),
        grid=grid,
        in_specs=in_specs,
        out_specs=out_spec,
        compiler_params=pltpu.CompilerParams(
            dimension_semantics=("parallel",)),
        cost_estimate=cost,
    )(*operands)

    return out_padded[:B, :OUT_DIM]


def make_params(key, input_dim):
    """Deterministic synthetic parameters matching the PyTorch module's shapes."""
    dims = [input_dim, 256, 128, 64, 32, 2]
    params = {}
    keys = jax.random.split(key, 32)
    ki = 0

    def uniform(k, shape, bound):
        return jax.random.uniform(k, shape, jnp.float32, -bound, bound)

    # Linear layers (weights stored as [in, out] = transpose of nn.Linear.weight).
    for li in range(5):
        fan_in, fan_out = dims[li], dims[li + 1]
        bound = 1.0 / jnp.sqrt(float(fan_in))
        params[f"w{li + 1}"] = uniform(keys[ki], (fan_in, fan_out), bound); ki += 1
        params[f"b{li + 1}"] = uniform(keys[ki], (1, fan_out), bound); ki += 1

    # BatchNorm1d layers (256, 128, 64) -> eval-mode folded scale/shift.
    for bi, feat in enumerate((256, 128, 64), start=1):
        gamma = 1.0 + 0.1 * jax.random.normal(keys[ki], (feat,), jnp.float32); ki += 1
        beta = 0.1 * jax.random.normal(keys[ki], (feat,), jnp.float32); ki += 1
        running_mean = 0.1 * jax.random.normal(keys[ki], (feat,), jnp.float32); ki += 1
        running_var = 1.0 + 0.1 * jax.random.uniform(keys[ki], (feat,), jnp.float32); ki += 1
        scale = gamma / jnp.sqrt(running_var + BN_EPS)
        shift = beta - running_mean * scale
        params[f"s{bi}"] = scale.reshape(1, feat)
        params[f"t{bi}"] = shift.reshape(1, feat)

    return params


def reference_forward(x, params):
    """Pure-JAX reference of the same eval-mode forward (unfolded params)."""
    h = x @ params["w1"] + params["b1"]
    h = _leaky_relu(h * params["s1"] + params["t1"])
    h = h @ params["w2"] + params["b2"]
    h = _leaky_relu(h * params["s2"] + params["t2"])
    h = h @ params["w3"] + params["b3"]
    h = _leaky_relu(h * params["s3"] + params["t3"])
    h = _leaky_relu(h @ params["w4"] + params["b4"])
    return h @ params["w5"] + params["b5"]


if __name__ == "__main__":
    INPUT_DIM = 32
    BATCH = 16

    root_key = jax.random.PRNGKey(0)
    pkey, xkey = jax.random.split(root_key)

    raw_params = make_params(pkey, INPUT_DIM)
    folded_params = prepare_params(raw_params)
    x = jax.random.normal(xkey, (BATCH, INPUT_DIM), jnp.float32)

    out = deep_predictor_forward(x, folded_params)
    out = jax.block_until_ready(out)

    ref = reference_forward(x, raw_params)
    assert out.shape == (BATCH, OUT_DIM)
    assert jnp.allclose(out, ref, atol=1e-4, rtol=1e-4), "Pallas output mismatch vs reference"

    print("KERNEL_OK")
</pallas_src>

<mosaic_0001>
module attributes {stable_mosaic.version = 11 : i64} {
  func.func @deep_predictor_kernel(%arg0: i32, %arg1: memref<16x32xf32, #tpu.memory_space<vmem>>, %arg2: memref<32x256xf32, #tpu.memory_space<vmem>>, %arg3: memref<1x256xf32, #tpu.memory_space<vmem>>, %arg4: memref<256x128xf32, #tpu.memory_space<vmem>>, %arg5: memref<1x128xf32, #tpu.memory_space<vmem>>, %arg6: memref<128x64xf32, #tpu.memory_space<vmem>>, %arg7: memref<1x64xf32, #tpu.memory_space<vmem>>, %arg8: memref<64x32xf32, #tpu.memory_space<vmem>>, %arg9: memref<1x32xf32, #tpu.memory_space<vmem>>, %arg10: memref<32x128xf32, #tpu.memory_space<vmem>>, %arg11: memref<1x128xf32, #tpu.memory_space<vmem>>, %arg12: memref<16x128xf32, #tpu.memory_space<vmem>>) attributes {dimension_semantics = [#tpu.dimension_semantics<parallel>], iteration_bounds = array<i64: 1>, scalar_prefetch = 0 : i64, scratch_operands = 0 : i64, tpu.core_type = #tpu.core_type<tc>, window_params = [{transform_indices = @transform_0, window_bounds = array<i64: 16, 32>}, {pipeline_mode = #tpu.pipeline_mode<synchronous>, transform_indices = @transform_1, window_bounds = array<i64: 32, 256>}, {pipeline_mode = #tpu.pipeline_mode<synchronous>, transform_indices = @transform_2, window_bounds = array<i64: 1, 256>}, {pipeline_mode = #tpu.pipeline_mode<synchronous>, transform_indices = @transform_3, window_bounds = array<i64: 256, 128>}, {pipeline_mode = #tpu.pipeline_mode<synchronous>, transform_indices = @transform_4, window_bounds = array<i64: 1, 128>}, {pipeline_mode = #tpu.pipeline_mode<synchronous>, transform_indices = @transform_5, window_bounds = array<i64: 128, 64>}, {pipeline_mode = #tpu.pipeline_mode<synchronous>, transform_indices = @transform_6, window_bounds = array<i64: 1, 64>}, {pipeline_mode = #tpu.pipeline_mode<synchronous>, transform_indices = @transform_7, window_bounds = array<i64: 64, 32>}, {pipeline_mode = #tpu.pipeline_mode<synchronous>, transform_indices = @transform_8, window_bounds = array<i64: 1, 32>}, {pipeline_mode = #tpu.pipeline_mode<synchronous>, transform_indices = @transform_9, window_bounds = array<i64: 32, 128>}, {pipeline_mode = #tpu.pipeline_mode<synchronous>, transform_indices = @transform_10, window_bounds = array<i64: 1, 128>}, {transform_indices = @transform_11, window_bounds = array<i64: 16, 128>}]} {
    %c0 = arith.constant 0 : index
    %c0_0 = arith.constant 0 : index
    %0 = vector.load %arg1[%c0, %c0_0] : memref<16x32xf32, #tpu.memory_space<vmem>>, vector<16x32xf32>
    %c0_1 = arith.constant 0 : index
    %c0_2 = arith.constant 0 : index
    %1 = vector.load %arg2[%c0_1, %c0_2] : memref<32x256xf32, #tpu.memory_space<vmem>>, vector<32x256xf32>
    %cst = arith.constant dense<0.000000e+00> : vector<16x256xf32>
    %2 = tpu.matmul %0, %1, %cst {dimension_numbers = #tpu.dot_dimension_numbers<[1], [0], [0], [1], [0, 0, 1, 1], [], []>} : vector<16x32xf32>, vector<32x256xf32>, vector<16x256xf32> -> vector<16x256xf32>
    %c0_3 = arith.constant 0 : index
    %c0_4 = arith.constant 0 : index
    %3 = vector.load %arg3[%c0_3, %c0_4] : memref<1x256xf32, #tpu.memory_space<vmem>>, vector<1x256xf32>
    %4 = vector.broadcast %3 : vector<1x256xf32> to vector<16x256xf32>
    %5 = arith.addf %2, %4 : vector<16x256xf32>
    %cst_5 = arith.constant 0.000000e+00 : f32
    %6 = vector.broadcast %cst_5 : f32 to vector<16x256xf32>
    %7 = arith.cmpf ogt, %5, %6 : vector<16x256xf32>
    %cst_6 = arith.constant 0.00999999977 : f32
    %8 = vector.broadcast %cst_6 : f32 to vector<16x256xf32>
    %9 = arith.mulf %8, %5 : vector<16x256xf32>
    %10 = arith.select %7, %5, %9 : vector<16x256xi1>, vector<16x256xf32>
    %c0_7 = arith.constant 0 : index
    %c0_8 = arith.constant 0 : index
    %11 = vector.load %arg4[%c0_7, %c0_8] : memref<256x128xf32, #tpu.memory_space<vmem>>, vector<256x128xf32>
    %cst_9 = arith.constant dense<0.000000e+00> : vector<16x128xf32>
    %12 = tpu.matmul %10, %11, %cst_9 {dimension_numbers = #tpu.dot_dimension_numbers<[1], [0], [0], [1], [0, 0, 1, 1], [], []>} : vector<16x256xf32>, vector<256x128xf32>, vector<16x128xf32> -> vector<16x128xf32>
    %c0_10 = arith.constant 0 : index
    %c0_11 = arith.constant 0 : index
    %13 = vector.load %arg5[%c0_10, %c0_11] : memref<1x128xf32, #tpu.memory_space<vmem>>, vector<1x128xf32>
    %14 = vector.broadcast %13 : vector<1x128xf32> to vector<16x128xf32>
    %15 = arith.addf %12, %14 : vector<16x128xf32>
    %cst_12 = arith.constant 0.000000e+00 : f32
    %16 = vector.broadcast %cst_12 : f32 to vector<16x128xf32>
    %17 = arith.cmpf ogt, %15, %16 : vector<16x128xf32>
    %cst_13 = arith.constant 0.00999999977 : f32
    %18 = vector.broadcast %cst_13 : f32 to vector<16x128xf32>
    %19 = arith.mulf %18, %15 : vector<16x128xf32>
    %20 = arith.select %17, %15, %19 : vector<16x128xi1>, vector<16x128xf32>
    %c0_14 = arith.constant 0 : index
    %c0_15 = arith.constant 0 : index
    %21 = vector.load %arg6[%c0_14, %c0_15] : memref<128x64xf32, #tpu.memory_space<vmem>>, vector<128x64xf32>
    %cst_16 = arith.constant dense<0.000000e+00> : vector<16x64xf32>
    %22 = tpu.matmul %20, %21, %cst_16 {dimension_numbers = #tpu.dot_dimension_numbers<[1], [0], [0], [1], [0, 0, 1, 1], [], []>} : vector<16x128xf32>, vector<128x64xf32>, vector<16x64xf32> -> vector<16x64xf32>
    %c0_17 = arith.constant 0 : index
    %c0_18 = arith.constant 0 : index
    %23 = vector.load %arg7[%c0_17, %c0_18] : memref<1x64xf32, #tpu.memory_space<vmem>>, vector<1x64xf32>
    %24 = vector.broadcast %23 : vector<1x64xf32> to vector<16x64xf32>
    %25 = arith.addf %22, %24 : vector<16x64xf32>
    %cst_19 = arith.constant 0.000000e+00 : f32
    %26 = vector.broadcast %cst_19 : f32 to vector<16x64xf32>
    %27 = arith.cmpf ogt, %25, %26 : vector<16x64xf32>
    %cst_20 = arith.constant 0.00999999977 : f32
    %28 = vector.broadcast %cst_20 : f32 to vector<16x64xf32>
    %29 = arith.mulf %28, %25 : vector<16x64xf32>
    %30 = arith.select %27, %25, %29 : vector<16x64xi1>, vector<16x64xf32>
    %c0_21 = arith.constant 0 : index
    %c0_22 = arith.constant 0 : index
    %31 = vector.load %arg8[%c0_21, %c0_22] : memref<64x32xf32, #tpu.memory_space<vmem>>, vector<64x32xf32>
    %cst_23 = arith.constant dense<0.000000e+00> : vector<16x32xf32>
    %32 = tpu.matmul %30, %31, %cst_23 {dimension_numbers = #tpu.dot_dimension_numbers<[1], [0], [0], [1], [0, 0, 1, 1], [], []>} : vector<16x64xf32>, vector<64x32xf32>, vector<16x32xf32> -> vector<16x32xf32>
    %c0_24 = arith.constant 0 : index
    %c0_25 = arith.constant 0 : index
    %33 = vector.load %arg9[%c0_24, %c0_25] : memref<1x32xf32, #tpu.memory_space<vmem>>, vector<1x32xf32>
    %34 = vector.broadcast %33 : vector<1x32xf32> to vector<16x32xf32>
    %35 = arith.addf %32, %34 : vector<16x32xf32>
    %cst_26 = arith.constant 0.000000e+00 : f32
    %36 = vector.broadcast %cst_26 : f32 to vector<16x32xf32>
    %37 = arith.cmpf ogt, %35, %36 : vector<16x32xf32>
    %cst_27 = arith.constant 0.00999999977 : f32
    %38 = vector.broadcast %cst_27 : f32 to vector<16x32xf32>
    %39 = arith.mulf %38, %35 : vector<16x32xf32>
    %40 = arith.select %37, %35, %39 : vector<16x32xi1>, vector<16x32xf32>
    %c0_28 = arith.constant 0 : index
    %c0_29 = arith.constant 0 : index
    %41 = vector.load %arg10[%c0_28, %c0_29] : memref<32x128xf32, #tpu.memory_space<vmem>>, vector<32x128xf32>
    %cst_30 = arith.constant dense<0.000000e+00> : vector<16x128xf32>
    %42 = tpu.matmul %40, %41, %cst_30 {dimension_numbers = #tpu.dot_dimension_numbers<[1], [0], [0], [1], [0, 0, 1, 1], [], []>} : vector<16x32xf32>, vector<32x128xf32>, vector<16x128xf32> -> vector<16x128xf32>
    %c0_31 = arith.constant 0 : index
    %c0_32 = arith.constant 0 : index
    %43 = vector.load %arg11[%c0_31, %c0_32] : memref<1x128xf32, #tpu.memory_space<vmem>>, vector<1x128xf32>
    %44 = vector.broadcast %43 : vector<1x128xf32> to vector<16x128xf32>
    %45 = arith.addf %42, %44 : vector<16x128xf32>
    %c0_33 = arith.constant 0 : index
    %c0_34 = arith.constant 0 : index
    %46 = vector.load %arg12[%c0_33, %c0_34] : memref<16x128xf32, #tpu.memory_space<vmem>>, vector<16x128xf32>
    tpu.vector_store %arg12[%c0_33, %c0_34], %45 {strides = array<i32>} : memref<16x128xf32, #tpu.memory_space<vmem>>, vector<16x128xf32>,
    return
  }
  func.func @transform_0(%arg0: i32) -> (i32, i32) {
    %c0_i32 = arith.constant 0 : i32
    %c0_i32_0 = arith.constant 0 : i32
    return %arg0, %c0_i32 : i32, i32
  }
  func.func @transform_1(%arg0: i32) -> (i32, i32) {
    %c0_i32 = arith.constant 0 : i32
    %c0_i32_0 = arith.constant 0 : i32
    %c0_i32_1 = arith.constant 0 : i32
    return %c0_i32, %c0_i32_0 : i32, i32
  }
  func.func @transform_2(%arg0: i32) -> (i32, i32) {
    %c0_i32 = arith.constant 0 : i32
    %c0_i32_0 = arith.constant 0 : i32
    %c0_i32_1 = arith.constant 0 : i32
    return %c0_i32, %c0_i32_0 : i32, i32
  }
  func.func @transform_3(%arg0: i32) -> (i32, i32) {
    %c0_i32 = arith.constant 0 : i32
    %c0_i32_0 = arith.constant 0 : i32
    %c0_i32_1 = arith.constant 0 : i32
    return %c0_i32, %c0_i32_0 : i32, i32
  }
  func.func @transform_4(%arg0: i32) -> (i32, i32) {
    %c0_i32 = arith.constant 0 : i32
    %c0_i32_0 = arith.constant 0 : i32
    %c0_i32_1 = arith.constant 0 : i32
    return %c0_i32, %c0_i32_0 : i32, i32
  }
  func.func @transform_5(%arg0: i32) -> (i32, i32) {
    %c0_i32 = arith.constant 0 : i32
    %c0_i32_0 = arith.constant 0 : i32
    %c0_i32_1 = arith.constant 0 : i32
    return %c0_i32, %c0_i32_0 : i32, i32
  }
  func.func @transform_6(%arg0: i32) -> (i32, i32) {
    %c0_i32 = arith.constant 0 : i32
    %c0_i32_0 = arith.constant 0 : i32
    %c0_i32_1 = arith.constant 0 : i32
    return %c0_i32, %c0_i32_0 : i32, i32
  }
  func.func @transform_7(%arg0: i32) -> (i32, i32) {
    %c0_i32 = arith.constant 0 : i32
    %c0_i32_0 = arith.constant 0 : i32
    %c0_i32_1 = arith.constant 0 : i32
    return %c0_i32, %c0_i32_0 : i32, i32
  }
  func.func @transform_8(%arg0: i32) -> (i32, i32) {
    %c0_i32 = arith.constant 0 : i32
    %c0_i32_0 = arith.constant 0 : i32
    %c0_i32_1 = arith.constant 0 : i32
    return %c0_i32, %c0_i32_0 : i32, i32
  }
  func.func @transform_9(%arg0: i32) -> (i32, i32) {
    %c0_i32 = arith.constant 0 : i32
    %c0_i32_0 = arith.constant 0 : i32
    %c0_i32_1 = arith.constant 0 : i32
    return %c0_i32, %c0_i32_0 : i32, i32
  }
  func.func @transform_10(%arg0: i32) -> (i32, i32) {
    %c0_i32 = arith.constant 0 : i32
    %c0_i32_0 = arith.constant 0 : i32
    %c0_i32_1 = arith.constant 0 : i32
    return %c0_i32, %c0_i32_0 : i32, i32
  }
  func.func @transform_11(%arg0: i32) -> (i32, i32) {
    %c0_i32 = arith.constant 0 : i32
    %c0_i32_0 = arith.constant 0 : i32
    return %arg0, %c0_i32 : i32, i32
  }
}

</mosaic_0001>

<bundles_post_ra>
// kernel: tpu_custom_call.1
= control target key start
LH: loop header
LB: loop body
LE: loop exit
PB: predicated region body
PF: predicated region fallthrough
CT: control target
= control target key end

     0   :  { %16 = vsyncpa [#allocation3], 0  ;;  %s1256_s0 = inlined_call_operand.hbm [shape: f32[16,32], index: 0, kind: input, shape index: {}]   ;;  %s1257_s1 = inlined_call_operand.hbm [shape: f32[32,256], index: 1, kind: input, shape index: {}]   ;;  %s1258_s2 = inlined_call_operand.vmem [shape: f32[1,256], index: 2, kind: input, shape index: {}]   ;;  %s1259_s3 = inlined_call_operand.vmem [shape: f32[256,128], index: 3, kind: input, shape index: {}]   ;;  %s1260_s4 = inlined_call_operand.vmem [shape: f32[1,128], index: 4, kind: input, shape index: {}]   ;;  %s1261_s5 = inlined_call_operand.vmem [shape: f32[128,64], index: 5, kind: input, shape index: {}]   ;;  %s1262_s6 = inlined_call_operand.vmem [shape: f32[1,64], index: 6, kind: input, shape index: {}]   ;;  %s1263_s7 = inlined_call_operand.vmem [shape: f32[64,32], index: 7, kind: input, shape index: {}]   ;;  %s1264_s8 = inlined_call_operand.vmem [shape: f32[1,32], index: 8, kind: input, shape index: {}]   ;;  %s1265_s9 = inlined_call_operand.vmem [shape: f32[32,128], index: 9, kind: input, shape index: {}]   ;;  %s1266_s10 = inlined_call_operand.vmem [shape: f32[1,128], index: 10, kind: input, shape index: {}]   ;;  %s1267_s11 = inlined_call_operand.hbm [shape: f32[16,128], index: 11, kind: output, shape index: {}]  }
   0x1   :  { %17 = vsyncpa [#allocation6], 0 }
   0x2   :  { %18 = vsyncpa [#allocation4], 0  ;;  %s947_s17 = smov [#allocation2]   ;;  %s875_s21 = scalar_lea.hbm %s1256_s0, 256 }
   0x3   :  { %s24_s18 = sshll.u32 %s947_s17, 4  ;;  %p876_p0 = scmp.ne.s32.totalorder %s1256_s0, %s875_s21  ;;  %s25_s18 = int_to_ptr.vmem [resolvable:$true] %s24_s18 }
   0x4   :  { %p879_p1 = scmp.lt.u32.totalorder %s875_s21, %s1256_s0 }
   0x6   :  { %p881_p2 = pnand %p879_p1, %p876_p0 }
   0x8   :  { %884 = shalt.err (!%p881_p2)
}
   0x9   :  { %s885_s26 = scalar_lea.vmem %s25_s18, 256  ;;  %p890_p4 = scmp.lt.s32.totalorder %s25_s18, %s25_s18 }
   0xa   :  { %p886_p3 = scmp.ne.s32.totalorder %s25_s18, %s885_s26  ;;  %p891_p5 = scmp.lt.s32.totalorder %s885_s26, %s885_s26 }
   0xc   :  { %p892_p6 = por %p891_p5, %p890_p4 }
   0xe   :  { %p893_p7 = pnand %p892_p6, %p886_p3 }
  0x10   :  { %896 = shalt.err (!%p893_p7)
}
  0x11   :  { %s948_s27 = smov 128   ;;  %s949_s28 = smov 8  }
  0x12   :  { %30 = dma.hbm_to_vmem [thread:$0]  %s1256_s0, 256, %s25_s18, [#allocation3], %s948_s27, %s948_s27, %s949_s28  }
  0x13   :  { %s950_s12 = smov [#allocation5]   ;;  %s897_s16 = scalar_lea.hbm %s1257_s1, 1024 }
  0x14   :  { %s36_s13 = sshll.u32 %s950_s12, 4  ;;  %p898_p8 = scmp.ne.s32.totalorder %s1257_s1, %s897_s16  ;;  %s37_s13 = int_to_ptr.vmem [resolvable:$true] %s36_s13 }
  0x15   :  { %p901_p9 = scmp.lt.u32.totalorder %s897_s16, %s1257_s1 }
  0x17   :  { %p903_p10 = pnand %p901_p9, %p898_p8 }
  0x19   :  { %906 = shalt.err (!%p903_p10)
}
  0x1a   :  { %s907_s22 = scalar_lea.vmem %s37_s13, 1024  ;;  %p912_p12 = scmp.lt.s32.totalorder %s37_s13, %s37_s13 }
  0x1b   :  { %p908_p11 = scmp.ne.s32.totalorder %s37_s13, %s907_s22  ;;  %p913_p13 = scmp.lt.s32.totalorder %s907_s22, %s907_s22 }
  0x1d   :  { %p914_p0 = por %p913_p13, %p912_p12 }
  0x1f   :  { %p915_p1 = pnand %p914_p0, %p908_p11 }
  0x21   :  { %918 = shalt.err (!%p915_p1)
}
  0x22   :  { %s951_s0 = smov 256   ;;  %s952_s18 = smov 16  }
  0x23   :  { %42 = dma.hbm_to_vmem [thread:$0]  %s1257_s1, 1024, %s37_s13, [#allocation6], %s951_s0, %s951_s0, %s952_s18  }
  0x24   :  { %941 = dma.done.wait [#allocation3], 256  }
  0x25   :  { %942 = vsyncadd [#allocation3], 4294967040 }
  0x26   :  { %943 = dma.done.wait [#allocation6], 1024  }
  0x27   :  { %944 = vsyncadd [#allocation6], 4294966272  ;;  %v953_v0 = vmov 0.0   ;;  %v70_v1 = vld [vmem:[#allocation5 + $0x8] sm:$0xff]  ;;  %v72_v2 = vld [vmem:[#allocation5 + $0x18] sm:$0xff]  ;;  %vm89_vm0 = vcmask 261120  }
  0x28   :  { %160 = vmatprep.mubr.f32.mxu0 %v953_v0  ;;  %v69_v3 = vld [vmem:[#allocation5] sm:$0xff]  ;;  %v771_v4 = vpack.c.bf16 %v72_v2, %v70_v1  ;;  %v71_v5 = vld [vmem:[#allocation5 + $0x10] sm:$0xff]  ;;  %v74_v6 = vld [vmem:[#allocation5 + $0x28] sm:$0xff]  ;;  %vm424_vm9 = vcmask 523264   ;;  %s954_s13 = smov [#allocation7]  }
  0x29   :  { %v76_v7 = vld [vmem:[#allocation5 + $0x38] sm:$0xff]  ;;  %v773_v8 = vpack.c.bf16 %v71_v5, %v69_v3  ;;  %v73_v10 = vld [vmem:[#allocation5 + $0x20] sm:$0xff]  ;;  %v75_v11 = vld [vmem:[#allocation5 + $0x30] sm:$0xff] }
  0x2a   :  { %v775_v9 = vpack.c.bf16 %v76_v7, %v74_v6  ;;  %772 = vmatprep.subr.bf16.mxu0 %v771_v4  ;;  %v201_v12 = vld [vmem:[%s1259_s3 + $0x80] sm:$0xff]  ;;  %v202_v13 = vld [vmem:[%s1259_s3 + $0x88] sm:$0xff]  ;;  %v777_v14 = vpack.c.bf16 %v75_v11, %v73_v10  ;;  %v203_v18 = vld [vmem:[%s1259_s3 + $0x90] sm:$0xff] }
  0x2b   :  { %774 = vmatpush1.bf16.msra.mxu0 %v773_v8  ;;  %v779_v15 = vpack.c.bf16 %v202_v13, %v201_v12  ;;  %v185_v16 = vld [vmem:[%s1259_s3] sm:$0xff]  ;;  %v186_v17 = vld [vmem:[%s1259_s3 + $0x8] sm:$0xff]  ;;  %v204_v20 = vld [vmem:[%s1259_s3 + $0x98] sm:$0xff] }
  0x2c   :  { %776 = vmatprep.subr.bf16.mxu0 %v775_v9  ;;  %v781_v19 = vpack.c.bf16 %v186_v17, %v185_v16  ;;  %v187_v21 = vld [vmem:[%s1259_s3 + $0x10] sm:$0xff]  ;;  %v188_v22 = vld [vmem:[%s1259_s3 + $0x18] sm:$0xff]  ;;  %v783_v23 = vpack.c.bf16 %v204_v20, %v203_v18  ;;  %v205_v24 = vld [vmem:[%s1259_s3 + $0xa0] sm:$0xff] }
  0x2d   :  { %780 = vmatprep.subr.bf16.mxu1 %v779_v15  ;;  %v206_v25 = vld [vmem:[%s1259_s3 + $0xa8] sm:$0xff]  ;;  %v785_v26 = vpack.c.bf16 %v188_v22, %v187_v21  ;;  %v67_v27 = vld [vmem:[#allocation2] sm:$0xff]  ;;  %v207_v31 = vld [vmem:[%s1259_s3 + $0xb0] sm:$0xff] }
  0x2e   :  { %782 = vmatpush3.bf16.msra.mxu1 %v781_v19  ;;  %v787_v28 = vpack.c.bf16 %v206_v25, %v205_v24  ;;  %v189_v29 = vld [vmem:[%s1259_s3 + $0x20] sm:$0xff]  ;;  %v190_v30 = vld [vmem:[%s1259_s3 + $0x28] sm:$0xff]  ;;  %v208_v32 = vld [vmem:[%s1259_s3 + $0xb8] sm:$0xff] }
  0x2f   :  { %778 = vmatpush1.bf16.msra.mxu0 %v777_v14  ;;  %784 = vmatprep.subr.bf16.mxu1 %v783_v23  ;;  %v789_v33 = vpack.c.bf16 %v190_v30, %v189_v29  ;;  %v68_v34 = vld [vmem:[#allocation2 + $0x8] sm:$0xff]  ;;  %v791_v35 = vpack.c.bf16 %v208_v32, %v207_v31  ;;  %v191_v36 = vld [vmem:[%s1259_s3 + $0x30] sm:$0xff]  ;;  %v192_v37 = vld [vmem:[%s1259_s3 + $0x38] sm:$0xff]  ;;  %v79_v14 = vlaneseq }
  0x30   :  { %v209_v38 = vld [vmem:[%s1259_s3 + $0xc0] sm:$0xff]  ;;  %v210_v39 = vld [vmem:[%s1259_s3 + $0xc8] sm:$0xff]  ;;  %v793_v40 = vpack.c.bf16 %v192_v37, %v191_v36  ;;  %v211_v44 = vld [vmem:[%s1259_s3 + $0xd0] sm:$0xff] }
  0x31   :  { %v795_v41 = vpack.c.bf16 %v210_v39, %v209_v38  ;;  %v193_v42 = vld [vmem:[%s1259_s3 + $0x40] sm:$0xff]  ;;  %v194_v43 = vld [vmem:[%s1259_s3 + $0x48] sm:$0xff]  ;;  %v212_v45 = vld [vmem:[%s1259_s3 + $0xd8] sm:$0xff]  ;;  %v80_v15 = vshrl.u32 %v79_v14, 7 }
  0x32   :  { %624 = vmatmul.mubr.msk.f32.vlgmr.msra.gmra.mrb[0].mxu0 %vm89_vm0, %v67_v27  ;;  %786 = vmatpush3.bf16.msra.mxu1 %v785_v26  ;;  %v797_v46 = vpack.c.bf16 %v194_v43, %v193_v42  ;;  %v799_v47 = vpack.c.bf16 %v212_v45, %v211_v44  ;;  %v195_v48 = vld [vmem:[%s1259_s3 + $0x50] sm:$0xff]  ;;  %v196_v49 = vld [vmem:[%s1259_s3 + $0x58] sm:$0xff]  ;;  %v213_v51 = vld [vmem:[%s1259_s3 + $0xe0] sm:$0xff] }
  0x33   :  { %166 = vmatprep.mubr.f32.mxu0 %v953_v0  ;;  %788 = vmatprep.subr.bf16.mxu1 %v787_v28  ;;  %v801_v50 = vpack.c.bf16 %v196_v49, %v195_v48  ;;  %v214_v52 = vld [vmem:[%s1259_s3 + $0xe8] sm:$0xff]  ;;  %v197_v54 = vld [vmem:[%s1259_s3 + $0x60] sm:$0xff]  ;;  %v215_v57 = vld [vmem:[%s1259_s3 + $0xf0] sm:$0xff]  ;;  %v81_v16 = vsub.s32 0, %v80_v15  ;;  %v85_v18 = vsub.s32 1, %v80_v15 }
  0x34   :  { %v803_v53 = vpack.c.bf16 %v214_v52, %v213_v51  ;;  %v198_v55 = vld [vmem:[%s1259_s3 + $0x68] sm:$0xff]  ;;  %v216_v58 = vld [vmem:[%s1259_s3 + $0xf8] sm:$0xff]  ;;  %v199_v60 = vld [vmem:[%s1259_s3 + $0x70] sm:$0xff] }
  0x35   :  { %v805_v56 = vpack.c.bf16 %v198_v55, %v197_v54  ;;  %v807_v59 = vpack.c.bf16 %v216_v58, %v215_v57  ;;  %v200_v61 = vld [vmem:[%s1259_s3 + $0x78] sm:$0xff]  ;;  %v305_v63 = vld [vmem:[%s1261_s5] sm:$0xff]  ;;  %v306_v0 = vld [vmem:[%s1261_s5 + $0x8] sm:$0xff] }
  0x36   :  { %625 = vmatmul.mubr.msk.f32.gmra.mrb[2].mxu0 %vm89_vm0, %v68_v34  ;;  %790 = vmatpush3.bf16.msra.mxu1 %v789_v33  ;;  %v809_v62 = vpack.c.bf16 %v200_v61, %v199_v60  ;;  %v307_v1 = vld [vmem:[%s1261_s5 + $0x10] sm:$0xff]  ;;  %v811_v2 = vpack.c.bf16 %v306_v0, %v305_v63  ;;  %v308_v3 = vld [vmem:[%s1261_s5 + $0x18] sm:$0xff]  ;;  %v309_v5 = vld [vmem:[%s1261_s5 + $0x20] sm:$0xff] }
  0x37   :  { %792 = vmatprep.subr.bf16.mxu1 %v791_v35  ;;  %v815_v4 = vpack.c.bf16 %v308_v3, %v307_v1  ;;  %v310_v6 = vld [vmem:[%s1261_s5 + $0x28] sm:$0xff]  ;;  %v311_v8 = vld [vmem:[%s1261_s5 + $0x30] sm:$0xff]  ;;  %v312_v9 = vld [vmem:[%s1261_s5 + $0x38] sm:$0xff] }
  0x38   :  { %812 = vmatprep.subr.bf16.mxu0 %v811_v2  ;;  %v819_v7 = vpack.c.bf16 %v310_v6, %v309_v5  ;;  %v823_v10 = vpack.c.bf16 %v312_v9, %v311_v8  ;;  %v313_v11 = vld [vmem:[%s1261_s5 + $0x40] sm:$0xff]  ;;  %v314_v12 = vld [vmem:[%s1261_s5 + $0x48] sm:$0xff]  ;;  %v315_v37 = vld [vmem:[%s1261_s5 + $0x50] sm:$0xff] }
  0x39   :  { %814 = vmatpush3.bf16.msra.mxu0 %v811_v2  ;;  %v827_v13 = vpack.c.bf16 %v314_v12, %v313_v11  ;;  %v77_v17 = vld [vmem:[%s1258_s2] sm:$0x3]  ;;  %v316_v38 = vld [vmem:[%s1261_s5 + $0x58] sm:$0xff]  ;;  %v319_v43 = vld [vmem:[%s1261_s5 + $0x70] sm:$0xff] }
  0x3a   :  { %794 = vmatpush3.bf16.msra.mxu1 %v793_v40  ;;  %816 = vmatprep.subr.bf16.mxu0 %v815_v4  ;;  %v82_v19 = vrot.slane %v77_v17, %v81_v16  ;;  %v86_v20 = vrot.slane %v77_v17, %v85_v18  ;;  %v831_v39 = vpack.c.bf16 %v316_v38, %v315_v37  ;;  %v317_v40 = vld [vmem:[%s1261_s5 + $0x60] sm:$0xff]  ;;  %v320_v44 = vld [vmem:[%s1261_s5 + $0x78] sm:$0xff]  ;;  %v411_v48 = vld [vmem:[%s1263_s7 + $0x10] sm:$0xff] }
  0x3b   :  { %796 = vmatprep.subr.bf16.mxu1 %v795_v41  ;;  %v318_v41 = vld [vmem:[%s1261_s5 + $0x68] sm:$0xff]  ;;  %v839_v45 = vpack.c.bf16 %v320_v44, %v319_v43  ;;  %v413_v1 = vld [vmem:[%s1263_s7 + $0x20] sm:$0xff]  ;;  %v416_v5 = vld [vmem:[%s1263_s7 + $0x38] sm:$0xff] }
  0x3c   :  { %v835_v42 = vpack.c.bf16 %v318_v41, %v317_v40  ;;  %v414_v2 = vld [vmem:[%s1263_s7 + $0x28] sm:$0xff]  ;;  %v512_v16 = vld [vmem:[%s1265_s9] sm:$0xff] }
  0x3d   :  { %818 = vmatpush3.bf16.msra.mxu0 %v815_v4  ;;  %v851_v3 = vpack.c.bf16 %v414_v2, %v413_v1  ;;  %v415_v4 = vld [vmem:[%s1263_s7 + $0x30] sm:$0xff]  ;;  %v513_v17 = vld [vmem:[%s1265_s9 + $0x8] sm:$0xff] }
  0x3e   :  { %798 = vmatpush3.bf16.msra.mxu1 %v797_v46  ;;  %820 = vmatprep.subr.bf16.mxu0 %v819_v7  ;;  %v409_v46 = vld [vmem:[%s1263_s7] sm:$0xff]  ;;  %v855_v6 = vpack.c.bf16 %v416_v5, %v415_v4  ;;  %v859_v18 = vpack.c.bf16 %v513_v17, %v512_v16 }
  0x3f   :  { %800 = vmatprep.subr.bf16.mxu1 %v799_v47  ;;  %v410_v47 = vld [vmem:[%s1263_s7 + $0x8] sm:$0xff] }
  0x40   :  { %v843_v49 = vpack.c.bf16 %v410_v47, %v409_v46 }
  0x41   :  { %822 = vmatpush3.bf16.msra.mxu0 %v819_v7  ;;  %v627_v7 = vld [vmem:[%s1262_s6] ss:$0 sm:$0xff] }
  0x42   :  { %802 = vmatpush3.bf16.msra.mxu1 %v801_v50  ;;  %824 = vmatprep.subr.bf16.mxu0 %v823_v10  ;;  %v412_v50 = vld [vmem:[%s1263_s7 + $0x18] sm:$0xff] }
  0x43   :  { %804 = vmatprep.subr.bf16.mxu1 %v803_v53  ;;  %v847_v51 = vpack.c.bf16 %v412_v50, %v411_v48  ;;  %v626_v53 = vld [vmem:[%s1260_s4] ss:$0 sm:$0xff] }
  0x45   :  { %826 = vmatpush3.bf16.msra.mxu0 %v823_v10 }
  0x46   :  { %806 = vmatpush3.bf16.msra.mxu1 %v805_v56  ;;  %828 = vmatprep.subr.bf16.mxu0 %v827_v13 }
  0x47   :  { %808 = vmatprep.subr.bf16.mxu1 %v807_v59 }
  0x49   :  { %830 = vmatpush3.bf16.msra.mxu0 %v827_v13 }
  0x4a   :  { %810 = vmatpush3.bf16.msra.mxu1 %v809_v62  ;;  %832 = vmatprep.subr.bf16.mxu0 %v831_v39 }
  0x4b   :  { %844 = vmatprep.subr.bf16.mxu1 %v843_v49 }
  0x4d   :  { %834 = vmatpush3.bf16.msra.mxu0 %v831_v39 }
  0x4e   :  { %836 = vmatprep.subr.bf16.mxu0 %v835_v42 }
  0x51   :  { %838 = vmatpush3.bf16.msra.mxu0 %v835_v42 }
  0x52   :  { %840 = vmatprep.subr.bf16.mxu0 %v839_v45 }
  0x55   :  { %842 = vmatpush3.bf16.msra.mxu0 %v839_v45 }
  0x56   :  { %860 = vmatprep.subr.bf16.mxu0 %v859_v18 }
 0x105   :  { %v162_v21 = vpop.f32.mrb[0].mxu0 }
 0x106   :  { %v163_v22 = vadd.f32 %v162_v21, %v82_v19  ;;  %v164_v23 = vpop.f32.mrb[1].mxu0 }
 0x107   :  { %v165_v24 = vadd.f32 %v164_v23, %v86_v20 }
 0x108   :  { %v177_v25 = vmul.f32 0.01, %v163_v22  ;;  %vm173_vm2 = vcmp.gt.f32.partialorder %v163_v22, 0.0 }
 0x109   :  { %v168_v26 = vpop.f32.mrb[2].mxu0  ;;  %vm174_vm1 = vcmp.gt.f32.partialorder %v165_v24, 0.0  ;;  %v178_v27 = vmul.f32 0.01, %v165_v24 }
 0x10a   :  { %v169_v28 = vadd.f32 %v168_v26, %v82_v19  ;;  %v170_v29 = vpop.f32.mrb[3].mxu0  ;;  %v181_v33 = vsel %vm173_vm2, %v163_v22, %v177_v25  ;;  %v514_v19 = vld [vmem:[%s1265_s9 + $0x10] sm:$0xff]  ;;  %v628_v22 = vld [vmem:[%s1264_s8] ss:$0 sm:$0xff]  ;;  %s611_s8 = sshll.u32 %s954_s13, 4  ;;  %s612_s8 = int_to_ptr.vmem [resolvable:$true] %s611_s8 }
 0x10b   :  { %v171_v30 = vadd.f32 %v170_v29, %v86_v20  ;;  %v182_v31 = vsel %vm174_vm1, %v165_v24, %v178_v27  ;;  %v515_v20 = vld [vmem:[%s1265_s9 + $0x18] sm:$0xff]  ;;  %s919_s14 = scalar_lea.vmem %s612_s8, 256  ;;  %p924_p3 = scmp.lt.s32.totalorder %s612_s8, %s612_s8 }
 0x10c   :  { %v179_v32 = vmul.f32 0.01, %v169_v28  ;;  %288 = vmatprep.mubr.f32.mxu1 %v182_v31  ;;  %vm175_vm4 = vcmp.gt.f32.partialorder %v169_v28, 0.0  ;;  %v863_v21 = vpack.c.bf16 %v515_v20, %v514_v19  ;;  %v631_v31 = vld [vmem:[%s1266_s10] ss:$0 sm:$0xff]  ;;  %p920_p2 = scmp.ne.s32.totalorder %s612_s8, %s919_s14  ;;  %p925_p4 = scmp.lt.s32.totalorder %s919_s14, %s919_s14 }
 0x10d   :  { %v180_v34 = vmul.f32 0.01, %v171_v30  ;;  %289 = vmatmul.mubr.f32.vlgmr.msra.gmra.mrb[0].mxu1 %v181_v33  ;;  %vm176_vm3 = vcmp.gt.f32.partialorder %v171_v30, 0.0 }
 0x10e   :  { %v183_v36 = vsel %vm175_vm4, %v169_v28, %v179_v32  ;;  %846 = vmatpush3.bf16.msra.mxu1 %v843_v49  ;;  %p926_p5 = por %p925_p4, %p924_p3 }
 0x10f   :  { %v184_v35 = vsel %vm176_vm3, %v171_v30, %v180_v34  ;;  %848 = vmatprep.subr.bf16.mxu1 %v847_v51 }
 0x110   :  { %293 = vmatprep.mubr.f32.mxu1 %v184_v35  ;;  %p927_p6 = pnand %p926_p5, %p920_p2 }
 0x111   :  { %294 = vmatmul.mubr.f32.gmra.mrb[2].mxu1 %v183_v36 }
 0x112   :  { %850 = vmatpush3.bf16.msra.mxu1 %v847_v51 }
 0x113   :  { %852 = vmatprep.subr.bf16.mxu1 %v851_v3 }
 0x116   :  { %854 = vmatpush3.bf16.msra.mxu1 %v851_v3 }
 0x117   :  { %856 = vmatprep.subr.bf16.mxu1 %v855_v6 }
 0x11a   :  { %858 = vmatpush3.bf16.msra.mxu1 %v855_v6 }
 0x1e0   :  { %v666_v52 = vpop.f32.mrb[0].mxu1 }
 0x1e1   :  { %v667_v54 = vpop.f32.mrb[1].mxu1 }
 0x1e2   :  { %v668_v55 = vadd.f32 %v667_v54, %v666_v52 }
 0x1e4   :  { %v291_v56 = vadd.f32 %v668_v55, %v626_v53  ;;  %v669_v57 = vpop.f32.mrb[2].mxu1 }
 0x1e5   :  { %v670_v58 = vpop.f32.mrb[3].mxu1 }
 0x1e6   :  { %v671_v59 = vadd.f32 %v670_v58, %v669_v57  ;;  %vm299_vm5 = vcmp.gt.f32.partialorder %v291_v56, 0.0  ;;  %v301_v60 = vmul.f32 0.01, %v291_v56 }
 0x1e8   :  { %v296_v61 = vadd.f32 %v671_v59, %v626_v53  ;;  %v303_v62 = vsel %vm299_vm5, %v291_v56, %v301_v60 }
 0x1e9   :  { %738 = vmatprep.mubr.f32.mxu0 %v303_v62 }
 0x1ea   :  { %vm300_vm6 = vcmp.gt.f32.partialorder %v296_v61, 0.0  ;;  %v302_v63 = vmul.f32 0.01, %v296_v61 }
 0x1ec   :  { %v304_v0 = vsel %vm300_vm6, %v296_v61, %v302_v63 }
 0x1ed   :  { %739 = vmatmul.mubr.f32.vlgmr.msra.gmra.mrb[4].mxu0 %v304_v0 }
 0x1ee   :  { %862 = vmatpush3.bf16.msra.mxu0 %v859_v18 }
 0x1ef   :  { %864 = vmatprep.subr.bf16.mxu0 %v863_v21 }
 0x1f2   :  { %866 = vmatpush3.bf16.msra.mxu0 %v863_v21 }
 0x2c0   :  { %v740_v8 = vpop.f32.mrb[4].mxu0 }
 0x2c1   :  { %v400_v9 = vadd.f32 %v740_v8, %v627_v7  ;;  %v394_v10 = vpop.f32.mrb[5].mxu0 }
 0x2c2   :  { %v395_v11 = vadd.f32 %v627_v7, %v394_v10 }
 0x2c3   :  { %v406_v12 = vmul.f32 0.01, %v400_v9  ;;  %vm404_vm7 = vcmp.gt.f32.partialorder %v400_v9, 0.0 }
 0x2c4   :  { %vm403_vm8 = vcmp.gt.f32.partialorder %v395_v11, 0.0  ;;  %v405_v13 = vmul.f32 0.01, %v395_v11 }
 0x2c5   :  { %v408_v15 = vsel %vm404_vm7, %v400_v9, %v406_v12 }
 0x2c6   :  { %v407_v14 = vsel %vm403_vm8, %v395_v11, %v405_v13 }
 0x2c7   :  { %757 = vmatprep.mubr.msk.f32.mxu1 %vm424_vm9, %v407_v14 }
 0x2c8   :  { %758 = vmatmul.mubr.msk.f32.vlgmr.msra.gmra.mrb[4].mxu1 %vm424_vm9, %v408_v15 }
 0x39b   :  { %v759_v23 = vpop.f32.mrb[4].mxu1 }
 0x39c   :  { %v503_v24 = vadd.f32 %v759_v23, %v628_v22  ;;  %v497_v25 = vpop.f32.mrb[5].mxu1 }
 0x39d   :  { %v498_v26 = vadd.f32 %v628_v22, %v497_v25 }
 0x39e   :  { %v509_v27 = vmul.f32 0.01, %v503_v24  ;;  %vm507_vm10 = vcmp.gt.f32.partialorder %v503_v24, 0.0 }
 0x39f   :  { %vm506_vm11 = vcmp.gt.f32.partialorder %v498_v26, 0.0  ;;  %v508_v28 = vmul.f32 0.01, %v498_v26 }
 0x3a0   :  { %v511_v30 = vsel %vm507_vm10, %v503_v24, %v509_v27 }
 0x3a1   :  { %v510_v29 = vsel %vm506_vm11, %v498_v26, %v508_v28 }
 0x3a2   :  { %768 = vmatprep.mubr.msk.f32.mxu0 %vm89_vm0, %v510_v29 }
 0x3a3   :  { %769 = vmatmul.mubr.msk.f32.vlgmr.msra.gmra.mrb[6].mxu0 %vm89_vm0, %v511_v30 }
 0x476   :  { %v770_v32 = vpop.f32.mrb[6].mxu0 }
 0x477   :  { %v601_v33 = vadd.f32 %v770_v32, %v631_v31  ;;  %v595_v34 = vpop.f32.mrb[7].mxu0 }
 0x478   :  { %v596_v35 = vadd.f32 %v631_v31, %v595_v34 }
 0x479   :  { %605 = vst [vmem:[#allocation7 + $0x8] sm:$0xff] %v601_v33 }
 0x47a   :  { %604 = vst [vmem:[#allocation7] sm:$0xff] %v596_v35 }
 0x47b   :  { %930 = shalt.err (!%p927_p6)
}
 0x47c   :  { %s931_s10 = scalar_lea.hbm %s1267_s11, 256 }
 0x47d   :  { %p932_p7 = scmp.ne.s32.totalorder %s1267_s11, %s931_s10  ;;  %p935_p8 = scmp.lt.u32.totalorder %s931_s10, %s1267_s11 }
 0x47f   :  { %p937_p9 = pnand %p935_p8, %p932_p7 }
 0x481   :  { %940 = shalt.err (!%p937_p9)
}
 0x482   :  { %617 = dma.vmem_to_hbm [thread:$0]  %s612_s8, 256, %s1267_s11, [#allocation4], %s948_s27, %s948_s27, %s949_s28  }
 0x483   :  { %945 = dma.done.wait [#allocation4], 256  }
 0x484   :  { %946 = vsyncadd [#allocation4], 4294967040 }
 0x485   :  { %621 = vsyncpa [#allocation3], 1 }
 0x486   :  { %622 = vsyncpa [#allocation6], 1 }
 0x487   :  { %623 = vsyncpa [#allocation4], 1 }

</bundles_post_ra>
